<compile_context>
chip_gen: v7x
topology: tpu7x:2x2x1
jax: 0.10.0
libtpu: 0.0.40
codegen_flags: <defaults>
</compile_context>

<pallas_src>
import jax
import jax.numpy as jnp
from jax import lax
from jax.experimental import pallas as pl
from jax.experimental.pallas import tpu as pltpu

L = 128  # sequence length (lane-aligned)


def notch_kernel(x_ref, t_ref, o_ref):
    # x_ref: (TB, L) f32  -- row tile of independent mono signals
    # t_ref: (L, L)  f32  -- fused cascade matrix, resident across grid steps
    # o_ref: (TB, L) f32
    o_ref[...] = jnp.dot(
        x_ref[...],
        t_ref[...],
        preferred_element_type=jnp.float32,
        precision=lax.Precision.HIGHEST,  # exact f32 vs the conv reference
    ).astype(o_ref.dtype)


def _cascade_ref(x, w1, w2):
    """Pure-JAX reference == torch Conv1d cascade (cross-correlation).

    x: (N, L) rows of independent mono signals -> (N, L)."""
    xin = x[:, None, :]  # (N, 1, L)
    h = lax.conv_general_dilated(xin, w1, window_strides=(1,), padding=[(1, 1)],
                                 dimension_numbers=("NCH", "OIH", "NCH"))
    y = lax.conv_general_dilated(h, w2, window_strides=(1,), padding=[(3, 3)],
                                 dimension_numbers=("NCH", "OIH", "NCH"))
    return y[:, 0, :]


def _fused_matrix(w1, w2, length):
    """(L, L) matrix T such that cascade(x_row) == x_row @ T for every row.

    Built from the weights only (O(L^2), independent of batch size) by pushing
    the identity through the exact cascade, so the module's zero-padded
    intermediate boundary semantics are reproduced exactly."""
    eye = jnp.eye(length, dtype=jnp.float32)
    return _cascade_ref(eye, w1, w2)  # row i = cascade response to impulse e_i


def _round_up(n, m):
    return ((n + m - 1) // m) * m


def notch_filter(x, w1, w2, *, row_tile=None):
    """x: (N, L) f32 -- N independent mono signals (N=1 reproduces the
    module's (1, L) forward exactly).  w1: (3,1,3), w2: (1,3,7).  -> (N, L).
    """
    n, length = x.shape
    t_mat = _fused_matrix(w1.astype(jnp.float32), w2.astype(jnp.float32), length)

    # Row tile: >= 8 rows for full sublane occupancy; 256 rows fill the
    # v6e/v7x 256-wide MXU when the batch is large.  (Tiles stay tiny, so the
    # v7x 64 MiB VMEM budget is never a concern.)
    if row_tile is None:
        row_tile = 256 if n >= 256 else _round_up(max(n, 8), 8)
    n_pad = _round_up(n, row_tile)
    x_pad = jnp.pad(x.astype(jnp.float32), ((0, n_pad - n), (0, 0)))

    out = pl.pallas_call(
        notch_kernel,
        out_shape=jax.ShapeDtypeStruct((n_pad, length), jnp.float32),
        grid=(n_pad // row_tile,),
        in_specs=[
            pl.BlockSpec((row_tile, length), lambda i: (i, 0)),
            pl.BlockSpec((length, length), lambda i: (0, 0)),  # T resident
        ],
        out_specs=pl.BlockSpec((row_tile, length), lambda i: (i, 0)),
        compiler_params=pltpu.CompilerParams(
            dimension_semantics=("parallel",)),
    )(x_pad, t_mat)
    return out[:n].astype(x.dtype)


if __name__ == "__main__":
    key = jax.random.PRNGKey(0)
    kx, k1, k2 = jax.random.split(key, 3)

    # Conv1d weight shapes from __init__, PyTorch-style U(-1/sqrt(fan_in), ...).
    w1 = jax.random.uniform(k1, (3, 1, 3), jnp.float32,
                            -1.0 / 3 ** 0.5, 1.0 / 3 ** 0.5)
    w2 = jax.random.uniform(k2, (1, 3, 7), jnp.float32,
                            -1.0 / (3 * 7) ** 0.5, 1.0 / (3 * 7) ** 0.5)

    # 8 independent mono signals of length 128.  Each row is processed with the
    # module's exact (1, L) forward semantics; batching rows fills the (8,128)
    # vregs / MXU per the performance review.  (`t` arg of forward is unused.)
    x = jax.random.normal(kx, (8, L), jnp.float32)

    out = jax.block_until_ready(notch_filter(x, w1, w2))
    ref = _cascade_ref(x, w1, w2)

    assert out.shape == (8, L)
    err = jnp.max(jnp.abs(out - ref))
    assert jnp.allclose(out, ref, atol=1e-5, rtol=1e-5), f"mismatch vs reference (max abs err {err})"

    print("KERNEL_OK")
</pallas_src>

<mosaic_0001>
module attributes {stable_mosaic.version = 11 : i64} {
  func.func @notch_kernel(%arg0: i32, %arg1: memref<8x128xf32, #tpu.memory_space<vmem>>, %arg2: memref<128x128xf32, #tpu.memory_space<vmem>>, %arg3: memref<8x128xf32, #tpu.memory_space<vmem>>) attributes {dimension_semantics = [#tpu.dimension_semantics<parallel>], iteration_bounds = array<i64: 1>, scalar_prefetch = 0 : i64, scratch_operands = 0 : i64, tpu.core_type = #tpu.core_type<tc>, window_params = [{transform_indices = @transform_0, window_bounds = array<i64: 8, 128>}, {pipeline_mode = #tpu.pipeline_mode<synchronous>, transform_indices = @transform_1, window_bounds = array<i64: 128, 128>}, {transform_indices = @transform_2, window_bounds = array<i64: 8, 128>}]} {
    %c0 = arith.constant 0 : index
    %c0_0 = arith.constant 0 : index
    %0 = vector.load %arg1[%c0, %c0_0] : memref<8x128xf32, #tpu.memory_space<vmem>>, vector<8x128xf32>
    %c0_1 = arith.constant 0 : index
    %c0_2 = arith.constant 0 : index
    %1 = vector.load %arg2[%c0_1, %c0_2] : memref<128x128xf32, #tpu.memory_space<vmem>>, vector<128x128xf32>
    %cst = arith.constant dense<0.000000e+00> : vector<8x128xf32>
    %2 = tpu.matmul %0, %1, %cst {dimension_numbers = #tpu.dot_dimension_numbers<[1], [0], [0], [1], [0, 0, 1, 1], [], []>, precision = #tpu.contract_precision<fp32>} : vector<8x128xf32>, vector<128x128xf32>, vector<8x128xf32> -> vector<8x128xf32>
    %c0_3 = arith.constant 0 : index
    %c0_4 = arith.constant 0 : index
    %3 = vector.load %arg3[%c0_3, %c0_4] : memref<8x128xf32, #tpu.memory_space<vmem>>, vector<8x128xf32>
    tpu.vector_store %arg3[%c0_3, %c0_4], %2 {strides = array<i32>} : memref<8x128xf32, #tpu.memory_space<vmem>>, vector<8x128xf32>,
    return
  }
  func.func @transform_0(%arg0: i32) -> (i32, i32) {
    %c0_i32 = arith.constant 0 : i32
    %c0_i32_0 = arith.constant 0 : i32
    return %arg0, %c0_i32 : i32, i32
  }
  func.func @transform_1(%arg0: i32) -> (i32, i32) {
    %c0_i32 = arith.constant 0 : i32
    %c0_i32_0 = arith.constant 0 : i32
    %c0_i32_1 = arith.constant 0 : i32
    return %c0_i32, %c0_i32_0 : i32, i32
  }
  func.func @transform_2(%arg0: i32) -> (i32, i32) {
    %c0_i32 = arith.constant 0 : i32
    %c0_i32_0 = arith.constant 0 : i32
    return %arg0, %c0_i32 : i32, i32
  }
}

</mosaic_0001>

<bundles_post_ra>
// kernel: tpu_custom_call.1
= control target key start
LH: loop header
LB: loop body
LE: loop exit
PB: predicated region body
PF: predicated region fallthrough
CT: control target
= control target key end

     0   :  { %7 = vsyncpa [#allocation3], 0  ;;  %s1571_s0 = inlined_call_operand.hbm [shape: f32[8,128], index: 0, kind: input, shape index: {}]   ;;  %s1572_s1 = inlined_call_operand.hbm [shape: f32[128,128], index: 1, kind: input, shape index: {}]   ;;  %s1573_s2 = inlined_call_operand.hbm [shape: f32[8,128], index: 2, kind: output, shape index: {}]  }
   0x1   :  { %8 = vsyncpa [#allocation6], 0 }
   0x2   :  { %9 = vsyncpa [#allocation4], 0  ;;  %s1258_s9 = smov [#allocation2]   ;;  %s1259_s11 = smov [#allocation5]  }
   0x3   :  { %s16_s10 = sshll.u32 %s1258_s9, 4  ;;  %s25_s12 = sshll.u32 %s1259_s11, 4  ;;  %s17_s10 = int_to_ptr.vmem [resolvable:$true] %s16_s10  ;;  %s1281_s12 = int_to_ptr.vmem [resolvable:$true] %s25_s12 }
   0x4   :  { %s1186_s15 = scalar_lea.hbm %s1571_s0, 128 }
   0x5   :  { %p1187_p0 = scmp.ne.s32.totalorder %s1571_s0, %s1186_s15  ;;  %p1190_p1 = scmp.lt.u32.totalorder %s1186_s15, %s1571_s0 }
   0x7   :  { %p1192_p2 = pnand %p1190_p1, %p1187_p0 }
   0x9   :  { %1195 = shalt.err (!%p1192_p2)
}
   0xa   :  { %s1196_s20 = scalar_lea.vmem %s17_s10, 128  ;;  %p1201_p4 = scmp.lt.s32.totalorder %s17_s10, %s17_s10 }
   0xb   :  { %p1197_p3 = scmp.ne.s32.totalorder %s17_s10, %s1196_s20  ;;  %p1202_p5 = scmp.lt.s32.totalorder %s1196_s20, %s1196_s20 }
   0xd   :  { %p1203_p6 = por %p1202_p5, %p1201_p4 }
   0xf   :  { %p1204_p7 = pnand %p1203_p6, %p1197_p3 }
  0x11   :  { %1207 = shalt.err (!%p1204_p7)
}
  0x12   :  { %19 = dma.hbm_to_vmem [thread:$0]  %s1571_s0, 128, %s17_s10, [#allocation3]  }
  0x13   :  { %s1208_s25 = scalar_lea.hbm %s1572_s1, 2048 }
  0x14   :  { %p1209_p8 = scmp.ne.s32.totalorder %s1572_s1, %s1208_s25  ;;  %p1212_p9 = scmp.lt.u32.totalorder %s1208_s25, %s1572_s1 }
  0x16   :  { %p1214_p10 = pnand %p1212_p9, %p1209_p8 }
  0x18   :  { %1217 = shalt.err (!%p1214_p10)
}
  0x19   :  { %s1218_s30 = scalar_lea.vmem %s1281_s12, 2048  ;;  %p1223_p12 = scmp.lt.s32.totalorder %s1281_s12, %s1281_s12 }
  0x1a   :  { %p1219_p11 = scmp.ne.s32.totalorder %s1281_s12, %s1218_s30  ;;  %p1224_p13 = scmp.lt.s32.totalorder %s1218_s30, %s1218_s30 }
  0x1c   :  { %p1225_p0 = por %p1224_p13, %p1223_p12 }
  0x1e   :  { %p1226_p1 = pnand %p1225_p0, %p1219_p11 }
  0x20   :  { %1229 = shalt.err (!%p1226_p1)
}
  0x21   :  { %s1260_s0 = smov 128   ;;  %s1261_s3 = smov 8  }
  0x22   :  { %31 = dma.hbm_to_vmem [thread:$0]  %s1572_s1, 2048, %s1281_s12, [#allocation6], %s1260_s0, %s1260_s0, %s1261_s3  }
  0x23   :  { %1252 = dma.done.wait [#allocation3], 128  }
  0x24   :  { %1253 = vsyncadd [#allocation3], 4294967168 }
  0x25   :  { %1254 = dma.done.wait [#allocation6], 2048  }
  0x26   :  { %1255 = vsyncadd [#allocation6], 4294965248  ;;  %v1262_v0 = vmov 0.0|0.0   ;;  %vm1263_vm0 = vmmov 0   ;;  %v1264_v1 = vmov 0.0   ;;  %v39_v2 = vld [vmem:[#allocation5] sm:$0xff] }
  0x27   :  { %1025 = vmatprep.subr.bf16.mxu1 %v1262_v0  ;;  %1097 = vmatprep.subr.bf16.mxu0 %v1262_v0  ;;  %v40_v3 = vld [vmem:[#allocation5 + $0x8] sm:$0xff]  ;;  %v41_v4 = vld [vmem:[#allocation5 + $0x10] sm:$0xff]  ;;  %v56_v5 = vand.u32 4294901760, %v39_v2  ;;  %v42_v7 = vld [vmem:[#allocation5 + $0x18] sm:$0xff]  ;;  %s1265_s1 = smov [#allocation7]  }
  0x28   :  { %847 = vmatprep.mubr.msk.f32.mxu1 %vm1263_vm0, %v1264_v1  ;;  %952 = vmatprep.mubr.msk.f32.mxu0 %vm1263_vm0, %v1264_v1  ;;  %v59_v6 = vand.u32 4294901760, %v40_v3  ;;  %v62_v8 = vand.u32 4294901760, %v41_v4  ;;  %v65_v9 = vand.u32 4294901760, %v42_v7  ;;  %v43_v10 = vld [vmem:[#allocation5 + $0x20] sm:$0xff]  ;;  %v44_v11 = vld [vmem:[#allocation5 + $0x28] sm:$0xff]  ;;  %v45_v16 = vld [vmem:[#allocation5 + $0x30] sm:$0xff] }
  0x29   :  { %v68_v14 = vand.u32 4294901760, %v43_v10  ;;  %v71_v15 = vand.u32 4294901760, %v44_v11  ;;  %v46_v17 = vld [vmem:[#allocation5 + $0x38] sm:$0xff]  ;;  %v74_v19 = vand.u32 4294901760, %v45_v16  ;;  %v1332_v21 = vld [vmem:[#allocation5 + $0x40] sm:$0xff]  ;;  %v1334_v22 = vld [vmem:[#allocation5 + $0x48] sm:$0xff]  ;;  %v1348_v29 = vsub.f32 %v39_v2, %v56_v5 }
  0x2a   :  { %v1318_v12 = vpack.c.bf16 %v59_v6, %v56_v5  ;;  %v1322_v13 = vpack.c.bf16 %v65_v9, %v62_v8  ;;  %v77_v20 = vand.u32 4294901760, %v46_v17  ;;  %v80_v24 = vand.u32 4294901760, %v1332_v21  ;;  %v38_v26 = vld [vmem:[#allocation2] sm:$0xff]  ;;  %v1344_v27 = vld [vmem:[#allocation5 + $0x50] sm:$0xff]  ;;  %v1360_v35 = vld [vmem:[#allocation5 + $0x60] sm:$0xff]  ;;  %s703_s6 = sshll.u32 %s1265_s1, 4  ;;  %s704_s6 = int_to_ptr.vmem [resolvable:$true] %s703_s6 }
  0x2b   :  { %v1328_v18 = vpack.c.bf16 %v71_v15, %v68_v14  ;;  %v83_v25 = vand.u32 4294901760, %v1334_v22  ;;  %v1346_v28 = vld [vmem:[#allocation5 + $0x58] sm:$0xff]  ;;  %v1350_v30 = vand.u32 4294901760, %v38_v26  ;;  %v1352_v31 = vsub.f32 %v40_v3, %v59_v6  ;;  %v1364_v36 = vld [vmem:[#allocation5 + $0x68] sm:$0xff]  ;;  %v1383_v43 = vld [vmem:[#allocation5 + $0x70] sm:$0xff]  ;;  %s1230_s7 = scalar_lea.vmem %s704_s6, 128  ;;  %p1235_p3 = scmp.lt.s32.totalorder %s704_s6, %s704_s6 }
  0x2c   :  { %1027 = vmatpush3.bf16.msra.mxu1 %v1318_v12  ;;  %1099 = vmatpush3.bf16.msra.mxu0 %v1318_v12  ;;  %v1338_v23 = vpack.c.bf16 %v77_v20, %v74_v19  ;;  %v86_v33 = vand.u32 4294901760, %v1344_v27  ;;  %v89_v34 = vand.u32 4294901760, %v1346_v28  ;;  %v1366_v37 = vsub.f32 %v41_v4, %v62_v8  ;;  %v1385_v44 = vld [vmem:[#allocation5 + $0x78] sm:$0xff]  ;;  %p1231_p2 = scmp.ne.s32.totalorder %s704_s6, %s1230_s7  ;;  %p1236_p4 = scmp.lt.s32.totalorder %s1230_s7, %s1230_s7 }
  0x2d   :  { %1028 = vmatprep.subr.bf16.mxu1 %v1262_v0  ;;  %1100 = vmatprep.subr.bf16.mxu0 %v1262_v0  ;;  %v1356_v32 = vpack.c.bf16 %v83_v25, %v80_v24  ;;  %v1368_v38 = vsub.f32 %v42_v7, %v65_v9  ;;  %v92_v39 = vand.u32 4294901760, %v1360_v35  ;;  %v1372_v40 = vsub.f32 %v38_v26, %v1350_v30 }
  0x2e   :  { %v1380_v41 = vpack.c.bf16 %v89_v34, %v86_v33  ;;  %v95_v42 = vand.u32 4294901760, %v1364_v36  ;;  %v149_v45 = vand.u32 4294901760, %v1348_v29  ;;  %v156_v46 = vand.u32 4294901760, %v1352_v31  ;;  %p1237_p5 = por %p1236_p4, %p1235_p3 }
  0x2f   :  { %v1391_v47 = vsub.f32 %v43_v10, %v68_v14  ;;  %v1393_v48 = vsub.f32 %v44_v11, %v71_v15  ;;  %v98_v49 = vand.u32 4294901760, %v1383_v43  ;;  %v101_v50 = vand.u32 4294901760, %v1385_v44 }
  0x30   :  { %1030 = vmatpush3.bf16.msra.mxu1 %v1322_v13  ;;  %1102 = vmatpush3.bf16.msra.mxu0 %v1322_v13  ;;  %v138_v51 = vand.u32 4294901760, %v1372_v40  ;;  %v163_v52 = vand.u32 4294901760, %v1366_v37  ;;  %v1405_v53 = vpack.c.bf16 %v95_v42, %v92_v39  ;;  %v150_v54 = vsub.f32 %v1348_v29, %v149_v45  ;;  %p1238_p6 = pnand %p1237_p5, %p1231_p2 }
  0x31   :  { %1031 = vmatprep.subr.bf16.mxu1 %v1262_v0  ;;  %1103 = vmatprep.subr.bf16.mxu0 %v1262_v0  ;;  %v157_v55 = vsub.f32 %v1352_v31, %v156_v46  ;;  %v170_v56 = vand.u32 4294901760, %v1368_v38  ;;  %v1412_v57 = vsub.f32 %v45_v16, %v74_v19  ;;  %v1414_v58 = vsub.f32 %v46_v17, %v77_v20 }
  0x32   :  { %v139_v59 = vsub.f32 %v1372_v40, %v138_v51  ;;  %v164_v60 = vsub.f32 %v1366_v37, %v163_v52  ;;  %v177_v61 = vand.u32 4294901760, %v1391_v47  ;;  %v184_v62 = vand.u32 4294901760, %v1393_v48 }
  0x33   :  { %v1426_v63 = vpack.c.bf16 %v101_v50, %v98_v49  ;;  %v151_v2 = vand.u32 4294901760, %v150_v54  ;;  %v158_v3 = vand.u32 4294901760, %v157_v55  ;;  %v171_v4 = vsub.f32 %v1368_v38, %v170_v56 }
  0x34   :  { %1033 = vmatpush3.bf16.msra.mxu1 %v1328_v18  ;;  %1105 = vmatpush3.bf16.msra.mxu0 %v1328_v18  ;;  %v1432_v5 = vsub.f32 %v1332_v21, %v80_v24  ;;  %v1435_v6 = vsub.f32 %v1334_v22, %v83_v25  ;;  %v1122_v7 = vpack.c.bf16 %v156_v46, %v149_v45  ;;  %v140_v8 = vand.u32 4294901760, %v139_v59 }
  0x35   :  { %1034 = vmatprep.subr.bf16.mxu1 %v1262_v0  ;;  %1106 = vmatprep.subr.bf16.mxu0 %v1262_v0  ;;  %v165_v9 = vand.u32 4294901760, %v164_v60  ;;  %v178_v10 = vsub.f32 %v1391_v47, %v177_v61  ;;  %v185_v11 = vsub.f32 %v1393_v48, %v184_v62  ;;  %v1050_v14 = vpack.c.bf16 %v158_v3, %v151_v2 }
  0x36   :  { %v172_v15 = vand.u32 4294901760, %v171_v4  ;;  %v191_v16 = vand.u32 4294901760, %v1412_v57  ;;  %v198_v17 = vand.u32 4294901760, %v1414_v58  ;;  %v1448_v19 = vsub.f32 %v1344_v27, %v86_v33 }
  0x37   :  { %v1453_v20 = vsub.f32 %v1346_v28, %v89_v34  ;;  %v1125_v21 = vpack.c.bf16 %v170_v56, %v163_v52  ;;  %v179_v22 = vand.u32 4294901760, %v178_v10  ;;  %v186_v24 = vand.u32 4294901760, %v185_v11 }
  0x38   :  { %1036 = vmatpush3.bf16.msra.mxu1 %v1338_v23  ;;  %1108 = vmatpush3.bf16.msra.mxu0 %v1338_v23  ;;  %v205_v25 = vand.u32 4294901760, %v1432_v5  ;;  %v1053_v26 = vpack.c.bf16 %v172_v15, %v165_v9  ;;  %v192_v45 = vsub.f32 %v1412_v57, %v191_v16  ;;  %v199_v27 = vsub.f32 %v1414_v58, %v198_v17 }
  0x39   :  { %1037 = vmatprep.subr.bf16.mxu1 %v1262_v0  ;;  %1109 = vmatprep.subr.bf16.mxu0 %v1262_v0  ;;  %v212_v33 = vand.u32 4294901760, %v1435_v6  ;;  %v1464_v28 = vsub.f32 %v1360_v35, %v92_v39  ;;  %v1469_v34 = vsub.f32 %v1364_v36, %v95_v42  ;;  %v1056_v46 = vpack.c.bf16 %v186_v24, %v179_v22 }
  0x3a   :  { %v206_v52 = vsub.f32 %v1432_v5, %v205_v25  ;;  %v219_v54 = vand.u32 4294901760, %v1448_v19  ;;  %v193_v35 = vand.u32 4294901760, %v192_v45  ;;  %v200_v39 = vand.u32 4294901760, %v199_v27 }
  0x3b   :  { %v213_v55 = vsub.f32 %v1435_v6, %v212_v33  ;;  %v226_v36 = vand.u32 4294901760, %v1453_v20  ;;  %v1484_v42 = vsub.f32 %v1383_v43, %v98_v49  ;;  %v1489_v56 = vsub.f32 %v1385_v44, %v101_v50 }
  0x3c   :  { %1039 = vmatpush3.bf16.msra.mxu1 %v1356_v32  ;;  %1111 = vmatpush3.bf16.msra.mxu0 %v1356_v32  ;;  %v1131_v59 = vpack.c.bf16 %v198_v17, %v191_v16  ;;  %v207_v60 = vand.u32 4294901760, %v206_v52  ;;  %v1059_v2 = vpack.c.bf16 %v200_v39, %v193_v35  ;;  %v240_v43 = vand.u32 4294901760, %v1469_v34 }
  0x3d   :  { %1040 = vmatprep.subr.bf16.mxu1 %v1262_v0  ;;  %1112 = vmatprep.subr.bf16.mxu0 %v1262_v0  ;;  %v214_v3 = vand.u32 4294901760, %v213_v55  ;;  %v227_v4 = vsub.f32 %v1453_v20, %v226_v36  ;;  %v1134_v44 = vpack.c.bf16 %v212_v33, %v205_v25  ;;  %v254_v11 = vand.u32 4294901760, %v1489_v56 }
  0x3e   :  { %v241_v10 = vsub.f32 %v1469_v34, %v240_v43 }
  0x3f   :  { %v228_v9 = vand.u32 4294901760, %v227_v4  ;;  %v255_v22 = vsub.f32 %v1489_v56, %v254_v11 }
  0x40   :  { %1042 = vmatpush3.bf16.msra.mxu1 %v1380_v41  ;;  %1114 = vmatpush3.bf16.msra.mxu0 %v1380_v41  ;;  %v242_v17 = vand.u32 4294901760, %v241_v10 }
  0x41   :  { %1043 = vmatprep.subr.bf16.mxu1 %v1262_v0  ;;  %1115 = vmatprep.subr.bf16.mxu0 %v1262_v0  ;;  %v256_v45 = vand.u32 4294901760, %v255_v22 }
  0x44   :  { %1045 = vmatpush3.bf16.msra.mxu1 %v1405_v53  ;;  %1117 = vmatpush3.bf16.msra.mxu0 %v1405_v53 }
  0x45   :  { %1046 = vmatprep.subr.bf16.mxu1 %v1262_v0  ;;  %1118 = vmatprep.subr.bf16.mxu0 %v1262_v0 }
  0x48   :  { %1048 = vmatpush3.bf16.msra.mxu1 %v1426_v63  ;;  %1120 = vmatpush3.bf16.msra.mxu0 %v1426_v63 }
  0x49   :  { %1049 = vmatprep.subr.bf16.mxu1 %v1262_v0  ;;  %1121 = vmatprep.subr.bf16.mxu0 %v1262_v0 }
  0x4b   :  { %848 = vmatmul.mubr.f32.vlgmr.msra.gmra.mrb[0].mxu1 %v140_v8  ;;  %953 = vmatmul.mubr.f32.vlgmr.msra.gmra.mrb[0].mxu0 %v138_v51  ;;  %v1128_v51 = vpack.c.bf16 %v184_v62, %v177_v61  ;;  %v220_v61 = vsub.f32 %v1448_v19, %v219_v54  ;;  %v233_v62 = vand.u32 4294901760, %v1464_v28  ;;  %v1062_v8 = vpack.c.bf16 %v214_v3, %v207_v60 }
  0x4c   :  { %1051 = vmatpush3.bf16.msra.mxu1 %v1050_v14  ;;  %1123 = vmatpush3.bf16.msra.mxu0 %v1122_v7  ;;  %v247_v7 = vand.u32 4294901760, %v1484_v42  ;;  %v1137_v14 = vpack.c.bf16 %v226_v36, %v219_v54 }
  0x4d   :  { %1052 = vmatprep.subr.bf16.mxu1 %v1262_v0  ;;  %1124 = vmatprep.subr.bf16.mxu0 %v1262_v0  ;;  %v221_v49 = vand.u32 4294901760, %v220_v61  ;;  %v234_v50 = vsub.f32 %v1464_v28, %v233_v62  ;;  %v1140_v25 = vpack.c.bf16 %v240_v43, %v233_v62 }
  0x4e   :  { %882 = vmatprep.mubr.msk.f32.mxu1 %vm1263_vm0, %v1264_v1  ;;  %987 = vmatprep.mubr.msk.f32.mxu0 %vm1263_vm0, %v1264_v1  ;;  %v1143_v33 = vpack.c.bf16 %v254_v11, %v247_v7 }
  0x4f   :  { %v235_v15 = vand.u32 4294901760, %v234_v50  ;;  %v1065_v16 = vpack.c.bf16 %v228_v9, %v221_v49 }
  0x50   :  { %1054 = vmatpush3.bf16.msra.mxu1 %v1053_v26  ;;  %1126 = vmatpush3.bf16.msra.mxu0 %v1125_v21  ;;  %v248_v21 = vsub.f32 %v1484_v42, %v247_v7 }
  0x51   :  { %1055 = vmatprep.subr.bf16.mxu1 %v1262_v0  ;;  %1127 = vmatprep.subr.bf16.mxu0 %v1262_v0  ;;  %v1068_v24 = vpack.c.bf16 %v242_v17, %v235_v15 }
  0x52   :  { %v249_v26 = vand.u32 4294901760, %v248_v21 }
  0x54   :  { %1057 = vmatpush3.bf16.msra.mxu1 %v1056_v46  ;;  %1129 = vmatpush3.bf16.msra.mxu0 %v1128_v51  ;;  %v1071_v27 = vpack.c.bf16 %v256_v45, %v249_v26  ;;  %v1074_v46 = vpack.c.bf16 %v1352_v31, %v1348_v29  ;;  %v1077_v51 = vpack.c.bf16 %v1368_v38, %v1366_v37 }
  0x55   :  { %1058 = vmatprep.subr.bf16.mxu1 %v1262_v0  ;;  %1130 = vmatprep.subr.bf16.mxu0 %v1262_v0  ;;  %v1080_v29 = vpack.c.bf16 %v1393_v48, %v1391_v47 }
  0x58   :  { %1060 = vmatpush3.bf16.msra.mxu1 %v1059_v2  ;;  %1132 = vmatpush3.bf16.msra.mxu0 %v1131_v59 }
  0x59   :  { %1061 = vmatprep.subr.bf16.mxu1 %v1262_v0  ;;  %1133 = vmatprep.subr.bf16.mxu0 %v1262_v0 }
  0x5c   :  { %1063 = vmatpush3.bf16.msra.mxu1 %v1062_v8  ;;  %1135 = vmatpush3.bf16.msra.mxu0 %v1134_v44 }
  0x5d   :  { %1064 = vmatprep.subr.bf16.mxu1 %v1262_v0  ;;  %1136 = vmatprep.subr.bf16.mxu0 %v1262_v0 }
  0x60   :  { %1066 = vmatpush3.bf16.msra.mxu1 %v1065_v16  ;;  %1138 = vmatpush3.bf16.msra.mxu0 %v1137_v14 }
  0x61   :  { %1067 = vmatprep.subr.bf16.mxu1 %v1262_v0  ;;  %1139 = vmatprep.subr.bf16.mxu0 %v1262_v0 }
  0x64   :  { %1069 = vmatpush3.bf16.msra.mxu1 %v1068_v24  ;;  %1141 = vmatpush3.bf16.msra.mxu0 %v1140_v25 }
  0x65   :  { %1070 = vmatprep.subr.bf16.mxu1 %v1262_v0  ;;  %1142 = vmatprep.subr.bf16.mxu0 %v1262_v0 }
  0x68   :  { %1072 = vmatpush3.bf16.msra.mxu1 %v1071_v27  ;;  %1144 = vmatpush3.bf16.msra.mxu0 %v1143_v33 }
  0x69   :  { %1073 = vmatprep.subr.bf16.mxu1 %v1262_v0  ;;  %1145 = vmatprep.subr.bf16.mxu0 %v1262_v0 }
  0x6b   :  { %883 = vmatmul.mubr.f32.vlgmr.msra.gmra.mrb[0].mxu1 %v1350_v30  ;;  %988 = vmatmul.mubr.f32.vlgmr.msra.gmra.mrb[0].mxu0 %v1350_v30 }
  0x6c   :  { %1075 = vmatpush3.bf16.msra.mxu1 %v1074_v46  ;;  %1147 = vmatpush3.bf16.msra.mxu0 %v1318_v12  ;;  %v1083_v12 = vpack.c.bf16 %v1414_v58, %v1412_v57 }
  0x6d   :  { %1076 = vmatprep.subr.bf16.mxu1 %v1262_v0  ;;  %1148 = vmatprep.subr.bf16.mxu0 %v1262_v0 }
  0x6e   :  { %917 = vmatprep.mubr.msk.f32.mxu1 %vm1263_vm0, %v1264_v1  ;;  %1022 = vmatprep.mubr.msk.f32.mxu0 %vm1263_vm0, %v1264_v1  ;;  %v1086_v1 = vpack.c.bf16 %v1435_v6, %v1432_v5 }
  0x70   :  { %1078 = vmatpush3.bf16.msra.mxu1 %v1077_v51  ;;  %1150 = vmatpush3.bf16.msra.mxu0 %v1322_v13  ;;  %v1089_v13 = vpack.c.bf16 %v1453_v20, %v1448_v19 }
  0x71   :  { %1079 = vmatprep.subr.bf16.mxu1 %v1262_v0  ;;  %1151 = vmatprep.subr.bf16.mxu0 %v1262_v0 }
  0x74   :  { %1081 = vmatpush3.bf16.msra.mxu1 %v1080_v29  ;;  %1153 = vmatpush3.bf16.msra.mxu0 %v1328_v18  ;;  %v1092_v18 = vpack.c.bf16 %v1469_v34, %v1464_v28 }
  0x75   :  { %1082 = vmatprep.subr.bf16.mxu1 %v1262_v0  ;;  %1154 = vmatprep.subr.bf16.mxu0 %v1262_v0 }
  0x78   :  { %1084 = vmatpush3.bf16.msra.mxu1 %v1083_v12  ;;  %1156 = vmatpush3.bf16.msra.mxu0 %v1338_v23  ;;  %v1095_v23 = vpack.c.bf16 %v1489_v56, %v1484_v42 }
  0x79   :  { %1085 = vmatprep.subr.bf16.mxu1 %v1262_v0  ;;  %1157 = vmatprep.subr.bf16.mxu0 %v1262_v0 }
  0x7c   :  { %1087 = vmatpush3.bf16.msra.mxu1 %v1086_v1  ;;  %1159 = vmatpush3.bf16.msra.mxu0 %v1356_v32 }
  0x7d   :  { %1088 = vmatprep.subr.bf16.mxu1 %v1262_v0  ;;  %1160 = vmatprep.subr.bf16.mxu0 %v1262_v0 }
  0x80   :  { %1090 = vmatpush3.bf16.msra.mxu1 %v1089_v13  ;;  %1162 = vmatpush3.bf16.msra.mxu0 %v1380_v41 }
  0x81   :  { %1091 = vmatprep.subr.bf16.mxu1 %v1262_v0  ;;  %1163 = vmatprep.subr.bf16.mxu0 %v1262_v0 }
  0x84   :  { %1093 = vmatpush3.bf16.msra.mxu1 %v1092_v18  ;;  %1165 = vmatpush3.bf16.msra.mxu0 %v1405_v53 }
  0x85   :  { %1094 = vmatprep.subr.bf16.mxu1 %v1262_v0  ;;  %1166 = vmatprep.subr.bf16.mxu0 %v1262_v0 }
  0x88   :  { %1096 = vmatpush3.bf16.msra.mxu1 %v1095_v23  ;;  %1168 = vmatpush3.bf16.msra.mxu0 %v1426_v63 }
  0x8b   :  { %918 = vmatmul.mubr.f32.vlgmr.msra.gmra.mrb[0].mxu1 %v1372_v40  ;;  %1023 = vmatmul.mubr.f32.vlgmr.msra.gmra.mrb[0].mxu0 %v1350_v30 }
 0x15e   :  { %v397_v31 = vpop.f32.mrb[0].mxu1  ;;  %v692_v32 = vpop.f32.mrb[0].mxu0 }
 0x15f   :  { %v1169_v37 = vadd.f32 %v692_v32, %v397_v31  ;;  %v919_v38 = vpop.f32.mrb[1].mxu1  ;;  %v1024_v41 = vpop.f32.mrb[1].mxu0 }
 0x161   :  { %696 = vst [vmem:[#allocation7] sm:$0xff] %v1169_v37 }
 0x162   :  { %1241 = shalt.err (!%p1238_p6)
}
 0x163   :  { %s1242_s10 = scalar_lea.hbm %s1573_s2, 128 }
 0x164   :  { %p1243_p7 = scmp.ne.s32.totalorder %s1573_s2, %s1242_s10  ;;  %p1246_p8 = scmp.lt.u32.totalorder %s1242_s10, %s1573_s2 }
 0x166   :  { %p1248_p9 = pnand %p1246_p8, %p1243_p7 }
 0x168   :  { %1251 = shalt.err (!%p1248_p9)
}
 0x169   :  { %706 = dma.vmem_to_hbm [thread:$0]  %s704_s6, 128, %s1573_s2, [#allocation4]  }
 0x16a   :  { %1256 = dma.done.wait [#allocation4], 128  }
 0x16b   :  { %1257 = vsyncadd [#allocation4], 4294967168 }
 0x16c   :  { %710 = vsyncpa [#allocation3], 1 }
 0x16d   :  { %711 = vsyncpa [#allocation6], 1 }
 0x16e   :  { %712 = vsyncpa [#allocation4], 1 }

</bundles_post_ra>
